<compile_context>
chip_gen: v7x
topology: tpu7x:2x2x1
jax: 0.10.0
libtpu: 0.0.40
codegen_flags: <defaults>
</compile_context>

<pallas_src>
import functools

import jax
import jax.numpy as jnp
from jax import lax
from jax.experimental import pallas as pl
from jax.experimental.pallas import tpu as pltpu

_LANES = 128
_NEG_INF = -1e30


def _round_up(x, m):
    return ((x + m - 1) // m) * m


def _w2v_kernel(idx_ref, fold_ref, b1_ref, w2_ref, b2_ref, o_ref, *,
                vocab_size, window, emb_size):
    """One batch tile of the CBOW forward pass.

    idx_ref  : (Bm, W)     int32  context word ids
    fold_ref : (W*Vp, E)   bf16   embedding folded through layer1:
                                  rows [w*Vp + v] = embedding[v] @ w1[:, wE:(w+1)E].T
                                  (rows with v >= vocab_size are zero pad)
    b1_ref   : (1, E)      f32
    w2_ref   : (Vp, E)     bf16   layer2 weight, PyTorch (out, in) layout, row-padded
    b2_ref   : (1, Vp)     f32    lane-padded
    o_ref    : (Bm, Vp)    f32    softmax probabilities (padded columns ~ 0)
    """
    bm = idx_ref.shape[0]
    vp = w2_ref.shape[0]

    idx = idx_ref[...]                                            # (Bm, W) int32
    col_ids = lax.broadcasted_iota(jnp.int32, (bm, vp), 1)        # (Bm, Vp)

    # ---- embedding gather + layer1 fused into ONE MXU matmul ----
    # The gather is an exact one-hot matmul (0/1 in bf16, f32 accumulation);
    # layer1 was pre-folded into `fold`, so a single (Bm, W*Vp) x (W*Vp, E)
    # contraction yields h_pre = b1 + sum_w (w1_w @ emb[idx_w]).
    # TODO(synk): for realistic vocab sizes replace the one-hot gather with a
    # scalar-prefetch / DMA row gather (O(B*W*E) instead of O(B*W*Vp*E)).
    onehot_cat = jnp.concatenate(
        [(idx[:, w:w + 1] == col_ids).astype(jnp.bfloat16) for w in range(window)],
        axis=1)                                                    # (Bm, W*Vp)
    h_pre = lax.dot_general(                                       # (Bm, E) f32
        onehot_cat, fold_ref[...], (((1,), (0,)), ((), ())),
        preferred_element_type=jnp.float32) + b1_ref[...]
    # sigmoid via EUP exp + approx reciprocal (keeps the divide off the VALU).
    h = pl.reciprocal(1.0 + jnp.exp(-h_pre), approx=True)          # (Bm, E) f32

    # ---- layer 2 logits: h @ w2.T + b2 (contract dim 1 of both operands) ----
    logits = lax.dot_general(
        h.astype(jnp.bfloat16), w2_ref[...], (((1,), (1,)), ((), ())),
        preferred_element_type=jnp.float32) + b2_ref[...]          # (Bm, Vp) f32

    # Mask the lane padding so it cannot contribute to the softmax
    # (statically skipped when vocab_size is already a multiple of 128).
    if vocab_size != vp:
        logits = jnp.where(col_ids < vocab_size, logits, _NEG_INF)

    # ---- softmax over the (padded) vocab axis ----
    # TODO(synk): for realistic vocab sizes tile Vp over a grid axis and use an
    # online/two-pass softmax with VMEM running max/sum scratch.
    m = jnp.max(logits, axis=-1, keepdims=True)
    e = jnp.exp(logits - m)
    s = jnp.sum(e, axis=-1, keepdims=True)
    o_ref[...] = e * pl.reciprocal(s, approx=True)


def prepare_params(embedding, w1, b1, w2, b2):
    """One-time packing of PyTorch-layout parameters for the kernel.

    * Pads the vocab axis to a multiple of 128 lanes.
    * Folds layer1 into the embedding table:
        fold[w*Vp + v] = embedding[v] @ w1[:, w*E:(w+1)*E].T
      so the per-call forward never touches w1 and does a single MXU matmul
      for (gather + layer1).
    * Stores the big weight tensors as bf16 (f32 accumulation in-kernel).
    Done once, outside the per-call forward.
    """
    embedding = jnp.asarray(embedding, jnp.float32)
    w1 = jnp.asarray(w1, jnp.float32)
    w2 = jnp.asarray(w2, jnp.float32)
    vocab_size, emb_size = embedding.shape
    window = w1.shape[1] // emb_size
    assert w1.shape == (emb_size, emb_size * window)

    vp = _round_up(vocab_size, _LANES)
    emb_p = jnp.zeros((vp, emb_size), jnp.float32).at[:vocab_size].set(embedding)
    fold = jnp.concatenate(
        [emb_p @ w1[:, w * emb_size:(w + 1) * emb_size].T for w in range(window)],
        axis=0)                                                    # (W*Vp, E)
    w2_p = jnp.zeros((vp, emb_size), jnp.float32).at[:vocab_size].set(w2)
    b2_p = jnp.zeros((1, vp), jnp.float32).at[0, :vocab_size].set(
        jnp.asarray(b2, jnp.float32))
    b1_2d = jnp.asarray(b1, jnp.float32).reshape(1, emb_size)
    return dict(fold=fold.astype(jnp.bfloat16), b1=b1_2d,
                w2=w2_p.astype(jnp.bfloat16), b2=b2_p,
                vocab_size=vocab_size, emb_size=emb_size, window=window)


def word2vec_forward_batch(contexts, params, *, block_b=256, interpret=False):
    """contexts: int32 (B, W) word ids; returns float32 (B, vocab_size)."""
    B, W = contexts.shape
    V = params["vocab_size"]
    E = params["emb_size"]
    assert W == params["window"], "context width must equal cbow_window_size"
    fold, b1, w2_p, b2_p = params["fold"], params["b1"], params["w2"], params["b2"]
    Vp = w2_p.shape[0]

    # Batch (M) tiling: 256 fills the v6e/v7x MXU, 128 matches v5e.  Keep the
    # tile a multiple of 8 sublanes and never larger than the (padded) batch.
    block_b = max(8, min(block_b, _round_up(B, 8)))
    Bp = _round_up(B, block_b)
    if Bp != B:
        contexts = jnp.pad(contexts, ((0, Bp - B), (0, 0)))  # pad id 0 is a valid row
    n_tiles = Bp // block_b

    kernel = functools.partial(_w2v_kernel, vocab_size=V, window=W, emb_size=E)

    out_p = pl.pallas_call(
        kernel,
        out_shape=jax.ShapeDtypeStruct((Bp, Vp), jnp.float32),
        grid=(n_tiles,),
        in_specs=[
            pl.BlockSpec((block_b, W), lambda i: (i, 0)),    # context ids
            pl.BlockSpec((W * Vp, E), lambda i: (0, 0)),     # folded emb+layer1 (bf16)
            pl.BlockSpec((1, E), lambda i: (0, 0)),          # layer1 bias
            pl.BlockSpec((Vp, E), lambda i: (0, 0)),         # layer2 weight (bf16)
            pl.BlockSpec((1, Vp), lambda i: (0, 0)),         # layer2 bias (lane-padded)
        ],
        out_specs=pl.BlockSpec((block_b, Vp), lambda i: (i, 0)),
        compiler_params=pltpu.CompilerParams(
            # batch axis is independent -> lets v7x's two TensorCores split it
            dimension_semantics=("parallel",)),
        interpret=interpret,
    )(contexts, fold, b1, w2_p, b2_p)

    return out_p[:B, :V]


def word2vec_forward(inputs, params, **kw):
    """inputs: int32 (W,) — matches the PyTorch module forward; returns (1, V)."""
    return word2vec_forward_batch(inputs[None, :], params, **kw)


def _init_params(key, embedding_size, vocab_size, window):
    """Deterministic init mirroring PyTorch default initializers (shapes only)."""
    k_emb, k_w1, k_b1, k_w2, k_b2 = jax.random.split(key, 5)
    embedding = jax.random.normal(k_emb, (vocab_size, embedding_size), jnp.float32)
    fan1 = embedding_size * window
    lim1 = 1.0 / jnp.sqrt(fan1)
    w1 = jax.random.uniform(k_w1, (embedding_size, fan1), jnp.float32, -lim1, lim1)
    b1 = jax.random.uniform(k_b1, (embedding_size,), jnp.float32, -lim1, lim1)
    fan2 = embedding_size
    lim2 = 1.0 / jnp.sqrt(fan2)
    w2 = jax.random.uniform(k_w2, (vocab_size, fan2), jnp.float32, -lim2, lim2)
    b2 = jax.random.uniform(k_b2, (vocab_size,), jnp.float32, -lim2, lim2)
    return embedding, w1, b1, w2, b2


def _reference(contexts, embedding, w1, b1, w2, b2):
    x = embedding[contexts].reshape(contexts.shape[0], -1)      # (B, W*E)
    h = jax.nn.sigmoid(x @ w1.T + b1)
    return jax.nn.softmax(h @ w2.T + b2, axis=-1)


if __name__ == "__main__":
    embedding_size = 32
    vocab_size = 64
    cbow_window_size = 4
    batch = 8

    key = jax.random.PRNGKey(0)
    k_params, k_inputs = jax.random.split(key)
    embedding, w1, b1, w2, b2 = _init_params(
        k_params, embedding_size, vocab_size, cbow_window_size
    )
    params = prepare_params(embedding, w1, b1, w2, b2)

    # A small batch of context windows (each row = what the PyTorch forward gets).
    contexts = jax.random.randint(
        k_inputs, (batch, cbow_window_size), 0, vocab_size, dtype=jnp.int32
    )

    out = word2vec_forward_batch(contexts, params)
    out = jax.block_until_ready(out)

    ref = _reference(contexts, embedding, w1, b1, w2, b2)
    assert out.shape == (batch, vocab_size)
    assert jnp.allclose(out, ref, atol=5e-3), "batched kernel mismatch vs reference"
    assert jnp.allclose(jnp.sum(out, axis=-1), 1.0, atol=5e-3)

    # Single-context path, identical signature/semantics to the PyTorch module.
    out1 = jax.block_until_ready(word2vec_forward(contexts[0], params))
    assert out1.shape == (1, vocab_size)
    assert jnp.allclose(out1, ref[:1], atol=5e-3), "single-context mismatch"

    print("KERNEL_OK")
</pallas_src>

<mosaic_0001>
module attributes {stable_mosaic.version = 11 : i64} {
  func.func @_w2v_kernel(%arg0: i32, %arg1: memref<8x4xi32, #tpu.memory_space<vmem>>, %arg2: memref<512x32xbf16, #tpu.memory_space<vmem>>, %arg3: memref<1x32xf32, #tpu.memory_space<vmem>>, %arg4: memref<128x32xbf16, #tpu.memory_space<vmem>>, %arg5: memref<1x128xf32, #tpu.memory_space<vmem>>, %arg6: memref<8x128xf32, #tpu.memory_space<vmem>>) attributes {dimension_semantics = [#tpu.dimension_semantics<parallel>], iteration_bounds = array<i64: 1>, scalar_prefetch = 0 : i64, scratch_operands = 0 : i64, tpu.core_type = #tpu.core_type<tc>, window_params = [{transform_indices = @transform_0, window_bounds = array<i64: 8, 4>}, {pipeline_mode = #tpu.pipeline_mode<synchronous>, transform_indices = @transform_1, window_bounds = array<i64: 512, 32>}, {pipeline_mode = #tpu.pipeline_mode<synchronous>, transform_indices = @transform_2, window_bounds = array<i64: 1, 32>}, {pipeline_mode = #tpu.pipeline_mode<synchronous>, transform_indices = @transform_3, window_bounds = array<i64: 128, 32>}, {pipeline_mode = #tpu.pipeline_mode<synchronous>, transform_indices = @transform_4, window_bounds = array<i64: 1, 128>}, {transform_indices = @transform_5, window_bounds = array<i64: 8, 128>}]} {
    %c0 = arith.constant 0 : index
    %c0_0 = arith.constant 0 : index
    %0 = vector.load %arg1[%c0, %c0_0] : memref<8x4xi32, #tpu.memory_space<vmem>>, vector<8x4xi32>
    %1 = tpu.iota {dimensions = array<i32: 1>} : vector<8x128xi32>
    %2 = vector.extract_strided_slice %0 {offsets = [0, 0], sizes = [8, 1], strides = [1, 1]} : vector<8x4xi32> to vector<8x1xi32>
    %3 = vector.broadcast %2 : vector<8x1xi32> to vector<8x128xi32>
    %4 = arith.cmpi eq, %3, %1 : vector<8x128xi32>
    %5 = arith.extui %4 : vector<8x128xi1> to vector<8x128xi32>
    %6 = arith.sitofp %5 : vector<8x128xi32> to vector<8x128xf32>
    %7 = arith.truncf %6 : vector<8x128xf32> to vector<8x128xbf16>
    %8 = vector.extract_strided_slice %0 {offsets = [0, 1], sizes = [8, 1], strides = [1, 1]} : vector<8x4xi32> to vector<8x1xi32>
    %9 = vector.broadcast %8 : vector<8x1xi32> to vector<8x128xi32>
    %10 = arith.cmpi eq, %9, %1 : vector<8x128xi32>
    %11 = arith.extui %10 : vector<8x128xi1> to vector<8x128xi32>
    %12 = arith.sitofp %11 : vector<8x128xi32> to vector<8x128xf32>
    %13 = arith.truncf %12 : vector<8x128xf32> to vector<8x128xbf16>
    %14 = vector.extract_strided_slice %0 {offsets = [0, 2], sizes = [8, 1], strides = [1, 1]} : vector<8x4xi32> to vector<8x1xi32>
    %15 = vector.broadcast %14 : vector<8x1xi32> to vector<8x128xi32>
    %16 = arith.cmpi eq, %15, %1 : vector<8x128xi32>
    %17 = arith.extui %16 : vector<8x128xi1> to vector<8x128xi32>
    %18 = arith.sitofp %17 : vector<8x128xi32> to vector<8x128xf32>
    %19 = arith.truncf %18 : vector<8x128xf32> to vector<8x128xbf16>
    %20 = vector.extract_strided_slice %0 {offsets = [0, 3], sizes = [8, 1], strides = [1, 1]} : vector<8x4xi32> to vector<8x1xi32>
    %21 = vector.broadcast %20 : vector<8x1xi32> to vector<8x128xi32>
    %22 = arith.cmpi eq, %21, %1 : vector<8x128xi32>
    %23 = arith.extui %22 : vector<8x128xi1> to vector<8x128xi32>
    %24 = arith.sitofp %23 : vector<8x128xi32> to vector<8x128xf32>
    %25 = arith.truncf %24 : vector<8x128xf32> to vector<8x128xbf16>
    %26 = tpu.concatenate %7, %13, %19, %25 in 1 : vector<8x128xbf16>, vector<8x128xbf16>, vector<8x128xbf16>, vector<8x128xbf16> -> vector<8x512xbf16>
    %c0_1 = arith.constant 0 : index
    %c0_2 = arith.constant 0 : index
    %27 = vector.load %arg2[%c0_1, %c0_2] : memref<512x32xbf16, #tpu.memory_space<vmem>>, vector<512x32xbf16>
    %cst = arith.constant dense<0.000000e+00> : vector<8x32xf32>
    %28 = tpu.matmul %26, %27, %cst {dimension_numbers = #tpu.dot_dimension_numbers<[1], [0], [0], [1], [0, 0, 1, 1], [], []>} : vector<8x512xbf16>, vector<512x32xbf16>, vector<8x32xf32> -> vector<8x32xf32>
    %c0_3 = arith.constant 0 : index
    %c0_4 = arith.constant 0 : index
    %29 = vector.load %arg3[%c0_3, %c0_4] : memref<1x32xf32, #tpu.memory_space<vmem>>, vector<1x32xf32>
    %30 = vector.broadcast %29 : vector<1x32xf32> to vector<8x32xf32>
    %31 = arith.addf %28, %30 : vector<8x32xf32>
    %cst_5 = arith.constant 0.000000e+00 : f32
    %32 = vector.broadcast %cst_5 : f32 to vector<8x32xf32>
    %33 = arith.subf %32, %31 : vector<8x32xf32>
    %34 = math.exp %33 : vector<8x32xf32>
    %cst_6 = arith.constant 1.000000e+00 : f32
    %35 = vector.broadcast %cst_6 : f32 to vector<8x32xf32>
    %36 = arith.addf %35, %34 : vector<8x32xf32>
    %37 = tpu.reciprocal %36 {approx = true} : vector<8x32xf32> -> vector<8x32xf32>
    %38 = arith.truncf %37 : vector<8x32xf32> to vector<8x32xbf16>
    %c0_7 = arith.constant 0 : index
    %c0_8 = arith.constant 0 : index
    %39 = vector.load %arg4[%c0_7, %c0_8] : memref<128x32xbf16, #tpu.memory_space<vmem>>, vector<128x32xbf16>
    %cst_9 = arith.constant dense<0.000000e+00> : vector<8x128xf32>
    %40 = tpu.matmul %38, %39, %cst_9 {dimension_numbers = #tpu.dot_dimension_numbers<[1], [1], [0], [0], [0, 0, 1, 0], [], []>} : vector<8x32xbf16>, vector<128x32xbf16>, vector<8x128xf32> -> vector<8x128xf32>
    %c0_10 = arith.constant 0 : index
    %c0_11 = arith.constant 0 : index
    %41 = vector.load %arg5[%c0_10, %c0_11] : memref<1x128xf32, #tpu.memory_space<vmem>>, vector<1x128xf32>
    %42 = vector.broadcast %41 : vector<1x128xf32> to vector<8x128xf32>
    %43 = arith.addf %40, %42 : vector<8x128xf32>
    %c64_i32 = arith.constant 64 : i32
    %44 = vector.broadcast %c64_i32 : i32 to vector<8x128xi32>
    %45 = arith.cmpi slt, %1, %44 : vector<8x128xi32>
    %cst_12 = arith.constant -1.000000e+30 : f32
    %46 = vector.broadcast %cst_12 : f32 to vector<8x128xf32>
    %47 = arith.select %45, %43, %46 : vector<8x128xi1>, vector<8x128xf32>
    %cst_13 = arith.constant dense<0xFF800000> : vector<8xf32>
    %48 = vector.multi_reduction <maximumf>, %47, %cst_13 [1] : vector<8x128xf32> to vector<8xf32>
    %49 = vector.shape_cast %48 : vector<8xf32> to vector<8x1xf32>
    %50 = vector.broadcast %49 : vector<8x1xf32> to vector<8x128xf32>
    %51 = arith.subf %47, %50 : vector<8x128xf32>
    %52 = math.exp %51 : vector<8x128xf32>
    %cst_14 = arith.constant dense<0.000000e+00> : vector<8xf32>
    %53 = vector.multi_reduction <add>, %52, %cst_14 [1] : vector<8x128xf32> to vector<8xf32>
    %54 = vector.shape_cast %53 : vector<8xf32> to vector<8x1xf32>
    %55 = tpu.reciprocal %54 {approx = true} : vector<8x1xf32> -> vector<8x1xf32>
    %56 = vector.broadcast %55 : vector<8x1xf32> to vector<8x128xf32>
    %57 = arith.mulf %52, %56 : vector<8x128xf32>
    %c0_15 = arith.constant 0 : index
    %c0_16 = arith.constant 0 : index
    %58 = vector.load %arg6[%c0_15, %c0_16] : memref<8x128xf32, #tpu.memory_space<vmem>>, vector<8x128xf32>
    tpu.vector_store %arg6[%c0_15, %c0_16], %57 {strides = array<i32>} : memref<8x128xf32, #tpu.memory_space<vmem>>, vector<8x128xf32>,
    return
  }
  func.func @transform_0(%arg0: i32) -> (i32, i32) {
    %c0_i32 = arith.constant 0 : i32
    %c0_i32_0 = arith.constant 0 : i32
    return %arg0, %c0_i32 : i32, i32
  }
  func.func @transform_1(%arg0: i32) -> (i32, i32) {
    %c0_i32 = arith.constant 0 : i32
    %c0_i32_0 = arith.constant 0 : i32
    %c0_i32_1 = arith.constant 0 : i32
    return %c0_i32, %c0_i32_0 : i32, i32
  }
  func.func @transform_2(%arg0: i32) -> (i32, i32) {
    %c0_i32 = arith.constant 0 : i32
    %c0_i32_0 = arith.constant 0 : i32
    %c0_i32_1 = arith.constant 0 : i32
    return %c0_i32, %c0_i32_0 : i32, i32
  }
  func.func @transform_3(%arg0: i32) -> (i32, i32) {
    %c0_i32 = arith.constant 0 : i32
    %c0_i32_0 = arith.constant 0 : i32
    %c0_i32_1 = arith.constant 0 : i32
    return %c0_i32, %c0_i32_0 : i32, i32
  }
  func.func @transform_4(%arg0: i32) -> (i32, i32) {
    %c0_i32 = arith.constant 0 : i32
    %c0_i32_0 = arith.constant 0 : i32
    %c0_i32_1 = arith.constant 0 : i32
    return %c0_i32, %c0_i32_0 : i32, i32
  }
  func.func @transform_5(%arg0: i32) -> (i32, i32) {
    %c0_i32 = arith.constant 0 : i32
    %c0_i32_0 = arith.constant 0 : i32
    return %arg0, %c0_i32 : i32, i32
  }
}

</mosaic_0001>

<bundles_post_ra>
// kernel: tpu_custom_call.1
= control target key start
LH: loop header
LB: loop body
LE: loop exit
PB: predicated region body
PF: predicated region fallthrough
CT: control target
= control target key end

     0   :  { %v772_v2 = vmov 1   ;;  %v773_v3 = vmov 3   ;;  %v774_v8 = vmov 0   ;;  %v775_v9 = vmov 2   ;;  %s967_s0 = inlined_call_operand.vmem [shape: s32[8,4], index: 0, kind: input, shape index: {}]   ;;  %s968_s1 = inlined_call_operand.vmem [shape: bf16[512,32], index: 1, kind: input, shape index: {}]   ;;  %s969_s2 = inlined_call_operand.vmem [shape: f32[1,32], index: 2, kind: input, shape index: {}]   ;;  %s970_s3 = inlined_call_operand.vmem [shape: bf16[128,32], index: 3, kind: input, shape index: {}]   ;;  %s971_s4 = inlined_call_operand.vmem [shape: f32[1,128], index: 4, kind: input, shape index: {}]   ;;  %s972_s5 = inlined_call_operand.hbm [shape: f32[8,128], index: 5, kind: output, shape index: {}]  }
   0x1   :  { %v22_v0 = vld [vmem:[%s967_s0] sm:$0xff]  ;;  %695 = vset.pattern.permute.xlu0 %v772_v2  ;;  %697 = vset.pattern.permute.xlu1 %v773_v3  ;;  %v702_v5 = vld [vmem:[%s968_s1 + $0x48] sm:$0xff]   ;;  %v704_v7 = vld [vmem:[%s968_s1 + $0x50] sm:$0xff]  }
   0x2   :  { %v700_v1 = vld [vmem:[%s968_s1 + $0x40] sm:$0xff]   ;;  %33 = vperm.xlu0 %695, %v22_v0   ;;  %47 = vperm.xlu1 %697, %v22_v0   ;;  %v703_v6 = vld [vmem:[%s968_s1 + $0x8] sm:$0xff]   ;;  %v705_v10 = vld [vmem:[%s968_s1 + $0x10] sm:$0xff]  }
   0x3   :  { %v701_v4 = vld [vmem:[%s968_s1] sm:$0xff]   ;;  %614 = vmatprep.subr.bf16.mxu1 %v700_v1  ;;  %v706_v11 = vld [vmem:[%s968_s1 + $0x58] sm:$0xff]   ;;  %v710_v15 = vld [vmem:[%s968_s1 + $0x68] sm:$0xff]  }
   0x4   :  { %615 = vmatpush3.bf16.msra.mxu1 %v701_v4  ;;  %v707_v12 = vld [vmem:[%s968_s1 + $0x18] sm:$0xff]   ;;  %v708_v13 = vld [vmem:[%s968_s1 + $0x60] sm:$0xff]   ;;  %v711_v16 = vld [vmem:[%s968_s1 + $0x28] sm:$0xff]  }
   0x5   :  { %616 = vmatprep.subr.bf16.mxu1 %v702_v5  ;;  %v709_v14 = vld [vmem:[%s968_s1 + $0x20] sm:$0xff]   ;;  %v712_v17 = vld [vmem:[%s968_s1 + $0x70] sm:$0xff]   ;;  %v714_v19 = vld [vmem:[%s968_s1 + $0x78] sm:$0xff]  }
   0x6   :  { %696 = vset.pattern.permute.xlu0 %v774_v8  ;;  %698 = vset.pattern.permute.xlu1 %v775_v9  ;;  %v713_v18 = vld [vmem:[%s968_s1 + $0x30] sm:$0xff]   ;;  %v715_v20 = vld [vmem:[%s968_s1 + $0x38] sm:$0xff]   ;;  %v716_v21 = vld [vmem:[%s968_s1 + $0xc0] sm:$0xff]  }
   0x7   :  { %26 = vperm.xlu0 %696, %v22_v0   ;;  %40 = vperm.xlu1 %698, %v22_v0  }
   0x8   :  { %617 = vmatpush3.bf16.msra.mxu1 %v703_v6 }
   0x9   :  { %618 = vmatprep.subr.bf16.mxu1 %v704_v7 }
   0xb   :  { %699 = vset.pattern.permute.xlu0 %v773_v3 }
   0xc   :  { %619 = vmatpush3.bf16.msra.mxu1 %v705_v10 }
   0xd   :  { %620 = vmatprep.subr.bf16.mxu1 %v706_v11 }
  0x10   :  { %621 = vmatpush3.bf16.msra.mxu1 %v707_v12 }
  0x11   :  { %622 = vmatprep.subr.bf16.mxu1 %v708_v13 }
  0x14   :  { %623 = vmatpush3.bf16.msra.mxu1 %v709_v14 }
  0x15   :  { %624 = vmatprep.subr.bf16.mxu1 %v710_v15 }
  0x18   :  { %625 = vmatpush3.bf16.msra.mxu1 %v711_v16 }
  0x19   :  { %626 = vmatprep.subr.bf16.mxu1 %v712_v17 }
  0x1c   :  { %627 = vmatpush3.bf16.msra.mxu1 %v713_v18 }
  0x1d   :  { %628 = vmatprep.subr.bf16.mxu1 %v714_v19 }
  0x20   :  { %629 = vmatpush3.bf16.msra.mxu1 %v715_v20 }
  0x21   :  { %636 = vmatprep.subr.bf16.mxu1 %v716_v21 }
  0x22   :  { %10 = vsyncpa [#allocation3], 0  ;;  %v23_v22 = vlaneseq  ;;  %v776_v26 = vmov 1.0|1.0   ;;  %v717_v28 = vld [vmem:[%s968_s1 + $0x80] sm:$0xff]   ;;  %v718_v29 = vld [vmem:[%s968_s1 + $0xc8] sm:$0xff]  }
  0x23   :  { %v719_v30 = vld [vmem:[%s968_s1 + $0x88] sm:$0xff]   ;;  %v720_v31 = vld [vmem:[%s968_s1 + $0xd0] sm:$0xff]   ;;  %v722_v33 = vld [vmem:[%s968_s1 + $0xd8] sm:$0xff]   ;;  %vm465_vm8 = vcmask 261120   ;;  %v777_v45 = vmov 0.0   ;;  %vm778_vm9 = vmmov 0  }
  0x24   :  { %v864_v23 = vand.u32 127, %v23_v22  ;;  %v721_v32 = vld [vmem:[%s968_s1 + $0x90] sm:$0xff]   ;;  %v723_v34 = vld [vmem:[%s968_s1 + $0x98] sm:$0xff]   ;;  %v724_v35 = vld [vmem:[%s968_s1 + $0xe0] sm:$0xff]   ;;  %667 = vmatprep.subr.bf16.mxu0 %v777_v45  ;;  %683 = vmatprep.mubr.msk.bf16.mxu0 %vm778_vm9, %v777_v45 }
  0x25   :  { %v725_v36 = vld [vmem:[%s968_s1 + $0xa0] sm:$0xff]   ;;  %v726_v37 = vld [vmem:[%s968_s1 + $0xe8] sm:$0xff]   ;;  %v728_v39 = vld [vmem:[%s968_s1 + $0xf0] sm:$0xff]  }
  0x26   :  { %v727_v38 = vld [vmem:[%s968_s1 + $0xa8] sm:$0xff]   ;;  %v729_v40 = vld [vmem:[%s968_s1 + $0xb0] sm:$0xff]   ;;  %v730_v41 = vld [vmem:[%s968_s1 + $0xf8] sm:$0xff]   ;;  %vm533_vm10 = vcmp.lt.s32.totalorder %v864_v23, 64 }
  0x27   :  { %v731_v43 = vld [vmem:[%s968_s1 + $0xb8] sm:$0xff]   ;;  %v732_v44 = vld [vmem:[%s970_s3] sm:$0xff]   ;;  %v733_v47 = vld [vmem:[%s970_s3 + $0x8] sm:$0xff]  }
  0x28   :  { %v470_v46 = vsel %vm465_vm8, %v732_v44, 0  ;;  %v473_v48 = vsel %vm465_vm8, %v733_v47, 0  ;;  %v734_v49 = vld [vmem:[%s970_s3 + $0x10] sm:$0xff]   ;;  %v735_v51 = vld [vmem:[%s970_s3 + $0x18] sm:$0xff]   ;;  %v736_v53 = vld [vmem:[%s970_s3 + $0x20] sm:$0xff]  }
  0x29   :  { %668 = vmatpush3.bf16.xpose.msra.mxu0 %v470_v46  ;;  %v476_v50 = vsel %vm465_vm8, %v734_v49, 0  ;;  %v479_v52 = vsel %vm465_vm8, %v735_v51, 0  ;;  %v482_v54 = vsel %vm465_vm8, %v736_v53, 0  ;;  %v737_v55 = vld [vmem:[%s970_s3 + $0x28] sm:$0xff]   ;;  %v738_v57 = vld [vmem:[%s970_s3 + $0x30] sm:$0xff]   ;;  %v739_v59 = vld [vmem:[%s970_s3 + $0x38] sm:$0xff]  }
  0x2a   :  { %669 = vmatprep.subr.bf16.mxu0 %v777_v45  ;;  %v485_v56 = vsel %vm465_vm8, %v737_v55, 0  ;;  %v488_v58 = vsel %vm465_vm8, %v738_v57, 0  ;;  %v491_v60 = vsel %vm465_vm8, %v739_v59, 0  ;;  %v563_v2 = vld [vmem:[%s969_s2] ss:$0 sm:$0xff]  ;;  %s779_s2 = smov [#allocation2]  }
  0x2b   :  { %v604_v16 = vld [vmem:[%s971_s4] ss:$0 sm:$0xff]  ;;  %s551_s24 = sshll.u32 %s779_s2, 4  ;;  %s552_s24 = int_to_ptr.vmem [resolvable:$true] %s551_s24 }
  0x2c   :  { %s748_s4 = scalar_lea.vmem %s552_s24, 128  ;;  %p753_p1 = scmp.lt.s32.totalorder %s552_s24, %s552_s24 }
  0x2d   :  { %p749_p0 = scmp.ne.s32.totalorder %s552_s24, %s748_s4  ;;  %p754_p2 = scmp.lt.s32.totalorder %s748_s4, %s748_s4 }
  0x2f   :  { %p755_p3 = por %p754_p2, %p753_p1 }
  0x31   :  { %670 = vmatpush3.bf16.xpose.msra.mxu0 %v473_v48  ;;  %p756_p4 = pnand %p755_p3, %p749_p0 }
  0x32   :  { %671 = vmatprep.subr.bf16.mxu0 %v777_v45 }
  0x39   :  { %672 = vmatpush3.bf16.xpose.msra.mxu0 %v476_v50 }
  0x3a   :  { %673 = vmatprep.subr.bf16.mxu0 %v777_v45 }
  0x41   :  { %674 = vmatpush3.bf16.xpose.msra.mxu0 %v479_v52 }
  0x42   :  { %675 = vmatprep.subr.bf16.mxu0 %v777_v45 }
  0x49   :  { %676 = vmatpush3.bf16.xpose.msra.mxu0 %v482_v54 }
  0x4a   :  { %677 = vmatprep.subr.bf16.mxu0 %v777_v45 }
  0x51   :  { %678 = vmatpush3.bf16.xpose.msra.mxu0 %v485_v56 }
  0x52   :  { %679 = vmatprep.subr.bf16.mxu0 %v777_v45 }
  0x59   :  { %680 = vmatpush3.bf16.xpose.msra.mxu0 %v488_v58 }
  0x5a   :  { %681 = vmatprep.subr.bf16.mxu0 %v777_v45 }
  0x61   :  { %682 = vmatpush3.bf16.xpose.msra.mxu0 %v491_v60 }
  0x81   :  { %v34_v24 = vpop.permute.xlu0 %33  ;;  %v48_v25 = vpop.permute.xlu1 %47 }
  0x82   :  { %vm35_vm0 = vcmp.eq.s32.totalorder %v34_v24, %v864_v23  ;;  %vm49_vm2 = vcmp.eq.s32.totalorder %v48_v25, %v864_v23 }
  0x83   :  { %vm596_vm1 = vmpackc.low %vm35_vm0, %vm35_vm0 }
  0x84   :  { %597 = vmatprep.mubr.msk.bf16.mxu1 %vm596_vm1, %v776_v26  ;;  %vm600_vm4 = vmpackc.low %vm49_vm2, %vm49_vm2 }
  0x86   :  { %v27_v27 = vpop.permute.xlu0 %26  ;;  %v41_v42 = vpop.permute.xlu1 %40 }
  0x87   :  { %vm28_vm3 = vcmp.eq.s32.totalorder %v27_v27, %v864_v23  ;;  %vm42_vm6 = vcmp.eq.s32.totalorder %v41_v42, %v864_v23 }
  0x88   :  { %vm598_vm5 = vmpackc.low %vm28_vm3, %vm28_vm3 }
  0x89   :  { %599 = vmatmul.mubr.msk.bf16.vlgmr.msra.gmra.mrb[0].mxu1 %vm598_vm5, %v776_v26  ;;  %vm602_vm7 = vmpackc.low %vm42_vm6, %vm42_vm6 }
  0x8a   :  { %637 = vmatpush3.bf16.msra.mxu1 %v717_v28  ;;  %601 = vmatprep.mubr.msk.bf16.mxu1 %vm600_vm4, %v776_v26 }
  0x8b   :  { %638 = vmatprep.subr.bf16.mxu1 %v718_v29 }
  0x8e   :  { %639 = vmatpush3.bf16.msra.mxu1 %v719_v30 }
  0x8f   :  { %640 = vmatprep.subr.bf16.mxu1 %v720_v31 }
  0x92   :  { %641 = vmatpush3.bf16.msra.mxu1 %v721_v32 }
  0x93   :  { %642 = vmatprep.subr.bf16.mxu1 %v722_v33 }
  0x96   :  { %643 = vmatpush3.bf16.msra.mxu1 %v723_v34 }
  0x97   :  { %644 = vmatprep.subr.bf16.mxu1 %v724_v35 }
  0x9a   :  { %645 = vmatpush3.bf16.msra.mxu1 %v725_v36 }
  0x9b   :  { %646 = vmatprep.subr.bf16.mxu1 %v726_v37 }
  0x9e   :  { %647 = vmatpush3.bf16.msra.mxu1 %v727_v38 }
  0x9f   :  { %648 = vmatprep.subr.bf16.mxu1 %v728_v39 }
  0xa2   :  { %649 = vmatpush3.bf16.msra.mxu1 %v729_v40 }
  0xa3   :  { %650 = vmatprep.subr.bf16.mxu1 %v730_v41 }
  0xa6   :  { %651 = vmatpush3.bf16.msra.mxu1 %v731_v43 }
  0xa9   :  { %603 = vmatmul.mubr.msk.bf16.vlgmr.msra.gmra.mrb[4].mxu1 %vm602_vm7, %v776_v26 }
 0x15c   :  { %v630_v61 = vpop.f32.mrb[0].mxu1 }
 0x15d   :  { %v631_v62 = vpop.f32.mrb[1].mxu1 }
 0x15e   :  { %v632_v63 = vadd.f32 %v631_v62, %v630_v61  ;;  %v633_v0 = vpop.f32.mrb[2].mxu1 }
 0x15f   :  { %v634_v1 = vpop.f32.mrb[3].mxu1 }
 0x160   :  { %v351_v5 = vadd.f32 %v632_v63, %v563_v2 }
 0x17c   :  { %v652_v3 = vpop.f32.mrb[4].mxu1 }
 0x17d   :  { %v653_v4 = vpop.f32.mrb[5].mxu1 }
 0x17e   :  { %v654_v6 = vadd.f32 %v653_v4, %v652_v3  ;;  %v655_v7 = vpop.f32.mrb[6].mxu1 }
 0x17f   :  { %v656_v8 = vpop.f32.mrb[7].mxu1 }
 0x180   :  { %v391_v9 = vadd.f32 %v654_v6, %v351_v5 }
 0x182   :  { %v396_v10 = vsub.f32 0.0, %v391_v9 }
 0x184   :  { %v397_v11 = vmul.f32 1.442695, %v396_v10 }
 0x186   :  { %740 = vpow2.f32 %v397_v11 }
 0x190   :  { %v741_v12 = vpop.eup %740 }
 0x191   :  { %v399_v13 = vadd.f32 1.0, %v741_v12 }
 0x193   :  { %742 = vrcp.f32 %v399_v13 }
 0x19d   :  { %v743_v14 = vpop.eup %742 }
 0x19e   :  { %v401_v15 = vpack.c.bf16 %v743_v14, %v743_v14 }
 0x1a0   :  { %684 = vmatmul.mubr.msk.bf16.vlgmr.msra.gmra.mrb[0].mxu0 %vm465_vm8, %v401_v15 }
 0x273   :  { %v527_v17 = vpop.f32.mrb[0].mxu0 }
 0x274   :  { %v528_v18 = vadd.f32 %v604_v16, %v527_v17  ;;  %v685_v19 = vpop.f32.mrb[1].mxu0 }
 0x275   :  { %v530_v20 = vpop.f32.mrb[2].mxu0 }
 0x276   :  { %v686_v21 = vpop.f32.mrb[3].mxu0  ;;  %v534_v22 = vsel %vm533_vm10, %v528_v18, -1e+30 }
 0x277   :  { %535 = vmax.xlane.f32.xlu1 %v534_v22 }
 0x304   :  { %v536_v24 = vpop.xlane.xlu1 %535 }
 0x305   :  { %v537_v25 = vsub.f32 %v534_v22, %v536_v24 }
 0x307   :  { %v538_v26 = vmul.f32 1.442695, %v537_v25 }
 0x309   :  { %744 = vpow2.f32 %v538_v26 }
 0x313   :  { %v745_v27 = vpop.eup %744 }
 0x314   :  { %540 = vadd.xlane.f32.xlu0 %v745_v27 }
 0x3a1   :  { %v541_v28 = vpop.xlane.xlu0 %540 }
 0x3a2   :  { %746 = vrcp.f32 %v541_v28 }
 0x3ac   :  { %v747_v29 = vpop.eup %746 }
 0x3ad   :  { %v543_v30 = vmul.f32 %v747_v29, %v745_v27 }
 0x3af   :  { %544 = vst [vmem:[#allocation2] sm:$0xff] %v543_v30 }
 0x3b0   :  { %759 = shalt.err (!%p756_p4)
}
 0x3b1   :  { %s760_s26 = scalar_lea.hbm %s972_s5, 128 }
 0x3b2   :  { %p761_p5 = scmp.ne.s32.totalorder %s972_s5, %s760_s26  ;;  %p764_p6 = scmp.lt.u32.totalorder %s760_s26, %s972_s5 }
 0x3b4   :  { %p766_p7 = pnand %p764_p6, %p761_p5 }
 0x3b6   :  { %769 = shalt.err (!%p766_p7)
}
 0x3b7   :  { %554 = dma.vmem_to_hbm [thread:$0]  %s552_s24, 128, %s972_s5, [#allocation3]  }
 0x3b8   :  { %770 = dma.done.wait [#allocation3], 128  }
 0x3b9   :  { %771 = vsyncadd [#allocation3], 4294967168 }
 0x3ba   :  { %558 = vsyncpa [#allocation3], 1 }

</bundles_post_ra>
